<compile_context>
chip_gen: v5e
topology: v5e:2x2
jax: 0.10.0
libtpu: 0.0.40
codegen_flags: <defaults>
</compile_context>

<pallas_src>
import functools
import math

import jax
import jax.numpy as jnp
import numpy as np
from jax.experimental import pallas as pl
from jax.experimental.pallas import tpu as pltpu


def _round_up(x, m):
    return (x + m - 1) // m * m


# ---------------------------------------------------------------------------
# Pallas kernel: one N-tile of the GatedEquivariantBlock forward.
# ---------------------------------------------------------------------------
def _geb_kernel(
    v_ref,        # [3, TN, E]  vectorial features, component-major (bf16)
    s_ref,        # [TN, E]     scalar features (bf16)
    was_ref,      # [E, E]      scalar half of scalar_feat_proj[0].weight, pre-T
    wav_ref,      # [E, E]      (Wa_v @ W1)^T  -- proj_1 folded in, pre-T
    ba_ref,       # [1, E]      scalar_feat_proj[0].bias (f32)
    w2_ref,       # [E, O]      vectorial_feat_proj_2.weight, pre-T
    wb_ref,       # [E, 2O]     de-interleaved scalar_feat_proj[2].weight, pre-T,
                  #             with the ScaledSiLU 1/0.6 factor folded in
    bb_ref,       # [1, 2O]     de-interleaved scalar_feat_proj[2].bias (f32)
    vec_out_ref,  # [3, TN, O]  output vectorial features (out_dtype)
    sca_out_ref,  # [TN, O]     output scalar features (out_dtype)
):
    c, tn, e = v_ref.shape
    o = w2_ref.shape[1]

    v = v_ref[...]                                    # [3, TN, E]

    # proj_2 on all three spatial components as a single MXU matmul.
    # (3, TN, E) -> (3*TN, E) is a layout no-op (leading-dim merge).
    p2 = jnp.dot(v.reshape(c * tn, e), w2_ref[...],
                 preferred_element_type=jnp.float32)  # [3*TN, O] f32

    # Scalar branch.  proj_1 (bias-free, only consumed via the spatial sum)
    # is folded into wav_ref, so only the spatial sum remains here.
    v_sum = v[0] + v[1] + v[2]                        # [TN, E]
    h = (jnp.dot(s_ref[...], was_ref[...], preferred_element_type=jnp.float32)
         + jnp.dot(v_sum, wav_ref[...], preferred_element_type=jnp.float32)
         + ba_ref[...])                               # [TN, E] f32

    # ScaledSiLU: SiLU in f32 (the 1/0.6 factor lives in wb_ref).  Approx
    # reciprocal goes to the otherwise-idle EUP slot instead of a VPU divide.
    h = h * pl.reciprocal(1.0 + jnp.exp(-h), approx=True)

    out2 = (jnp.dot(h.astype(v.dtype), wb_ref[...],
                    preferred_element_type=jnp.float32)
            + bb_ref[...])                            # [TN, 2O] f32
    sca = out2[:, :o]
    gate = out2[:, o:]

    sca_out_ref[...] = sca.astype(sca_out_ref.dtype)
    vec_out_ref[...] = (p2.reshape(c, tn, o)
                        * gate[None, :, :]).astype(vec_out_ref.dtype)


# ---------------------------------------------------------------------------
# VMEM footprint helpers (per-step, double-buffered) and auto tile sizing.
# ---------------------------------------------------------------------------
def _footprint(e, o_pad, in_bytes, out_bytes):
    per_row = (8 * e * in_bytes            # 2x-buffered v + s input tiles
               + 8 * o_pad * out_bytes     # 2x-buffered vec + sca output tiles
               + 4 * e + 20 * o_pad)       # f32 intermediates (h, p2, out2)
    weights = (2 * (2 * e * e + 3 * e * o_pad) * in_bytes   # 2x-buffered weights
               + 2 * (e + 2 * o_pad) * 4)                   # f32 biases
    return per_row, weights


def _auto_block_n(n, e, o_pad, in_bytes, out_bytes, budget=40 << 20, cap=1024):
    per_row, weights = _footprint(e, o_pad, in_bytes, out_bytes)
    tn = (budget - weights) // max(per_row, 1)
    tn = min(tn, cap, _round_up(n, 16))
    return max(16, (tn // 16) * 16)


# ---------------------------------------------------------------------------
# Wrappers.
# ---------------------------------------------------------------------------
def gated_equivariant_block_cm(v_cm, scalar_feat, prepped, *, out_dim=None,
                               block_n=None, out_dtype=None):
    """Component-major entry point: v_cm [3, N, E] -> ([3, N, O], [N, O]).

    Chained blocks should stay in this layout (and in the compute dtype) so
    no per-block transpose/cast HBM passes are paid at the boundary.
    """
    _, n, e = v_cm.shape
    cdt = prepped["w2_t"].dtype
    o_pad = prepped["w2_t"].shape[1]
    o = o_pad if out_dim is None else out_dim
    out_dtype = cdt if out_dtype is None else out_dtype

    in_bytes = jnp.dtype(cdt).itemsize
    out_bytes = jnp.dtype(out_dtype).itemsize
    if block_n is None:
        tn = _auto_block_n(n, e, o_pad, in_bytes, out_bytes)
    else:
        tn = max(16, min(_round_up(block_n, 16), _round_up(n, 16)))

    v_cm = v_cm.astype(cdt)       # no-op if the caller already supplies bf16
    s = scalar_feat.astype(cdt)

    # Ragged last block instead of jnp.pad: OOB reads are discarded garbage,
    # OOB writes are dropped by Pallas, and every op in the kernel is
    # row-local, so valid rows are unaffected.
    grid = (pl.cdiv(n, tn),)

    per_row, weights = _footprint(e, o_pad, in_bytes, out_bytes)
    est = weights + per_row * tn
    vmem_limit = int(min(max(est * 3 // 2, 32 << 20), 64 << 20))

    cost = pl.CostEstimate(
        flops=int(4 * n * e * e + 10 * n * e * o_pad),
        transcendentals=int(n * e),
        bytes_accessed=int(4 * n * e * in_bytes + 4 * n * o_pad * out_bytes
                           + (2 * e * e + 3 * e * o_pad) * in_bytes),
    )

    const = lambda shape: pl.BlockSpec(shape, lambda i: (0,) * len(shape))

    vec_cm, sca = pl.pallas_call(
        _geb_kernel,
        out_shape=(
            jax.ShapeDtypeStruct((3, n, o_pad), out_dtype),
            jax.ShapeDtypeStruct((n, o_pad), out_dtype),
        ),
        grid=grid,
        in_specs=[
            pl.BlockSpec((3, tn, e), lambda i: (0, i, 0)),   # v tile
            pl.BlockSpec((tn, e), lambda i: (i, 0)),         # s tile
            const((e, e)),          # wa_s^T          (VMEM-resident)
            const((e, e)),          # (Wa_v @ W1)^T   (VMEM-resident)
            const((1, e)),          # ba
            const((e, o_pad)),      # w2^T
            const((e, 2 * o_pad)),  # de-interleaved, scaled wb^T
            const((1, 2 * o_pad)),  # de-interleaved bb
        ],
        out_specs=(
            pl.BlockSpec((3, tn, o_pad), lambda i: (0, i, 0)),
            pl.BlockSpec((tn, o_pad), lambda i: (i, 0)),
        ),
        compiler_params=pltpu.CompilerParams(
            dimension_semantics=("parallel",),
            vmem_limit_bytes=vmem_limit),
        cost_estimate=cost,
    )(v_cm, s, prepped["wa_s_t"], prepped["wa_v_eff"], prepped["ba"],
      prepped["w2_t"], prepped["wb_t"], prepped["bb"])

    if o != o_pad:                 # drop lane padding (only when enabled)
        vec_cm = vec_cm[..., :o]
        sca = sca[..., :o]
    return vec_cm, sca


def gated_equivariant_block(vectorial_feat, scalar_feat, prepped, *,
                            out_dim=None, block_n=None, out_dtype=None):
    """PyTorch-convention wrapper: [N, E, 3], [N, E] -> ([N, O, 3], [N, O]).

    The boundary transposes cost an extra HBM pass each; callers chaining
    blocks should stay component-major and call gated_equivariant_block_cm.
    """
    v_cm = jnp.transpose(vectorial_feat, (2, 0, 1))          # [3, N, E]
    vec_cm, sca = gated_equivariant_block_cm(
        v_cm, scalar_feat, prepped, out_dim=out_dim, block_n=block_n,
        out_dtype=out_dtype)
    return jnp.transpose(vec_cm, (1, 2, 0)), sca             # [N, O, 3], [N, O]


# ---------------------------------------------------------------------------
# Parameters: init mirrors nn.init.xavier_uniform_ / zero bias; prepare_params
# builds the kernel-ready (pre-transposed, folded, bf16) weights once.
# ---------------------------------------------------------------------------
def _xavier_uniform(key, out_dim, in_dim):
    bound = math.sqrt(6.0 / (in_dim + out_dim))
    return jax.random.uniform(key, (out_dim, in_dim), jnp.float32, -bound, bound)


def init_params(key, embedding_dim, out_dim):
    k1, k2, k3, k4 = jax.random.split(key, 4)
    e, o = embedding_dim, out_dim
    return {
        "w1": _xavier_uniform(k1, e, e),        # vectorial_feat_proj_1.weight
        "w2": _xavier_uniform(k2, o, e),        # vectorial_feat_proj_2.weight
        "wa": _xavier_uniform(k3, e, 2 * e),    # scalar_feat_proj[0].weight
        "ba": jnp.zeros((e,), jnp.float32),     # scalar_feat_proj[0].bias
        "wb": _xavier_uniform(k4, 2 * o, e),    # scalar_feat_proj[2].weight
        "bb": jnp.zeros((2 * o,), jnp.float32), # scalar_feat_proj[2].bias
    }


def prepare_params(params, compute_dtype=jnp.bfloat16, pad_out_lanes=False):
    """Build kernel-ready weights (once, outside the forward).

    pad_out_lanes=True rounds out_dim up to a multiple of 128 so stores go
    out unmasked and the scalar/gate split lands on a lane-tile boundary.
    Worth it when out_dim >= ~128 and not 128-aligned; for tiny out_dim the
    extra output bytes outweigh the masked-store cost.
    """
    e = params["w1"].shape[0]
    o = params["w2"].shape[0]
    o_pad = _round_up(o, 128) if pad_out_lanes else o

    w1_t = params["w1"].T                       # [E, E]  (in, out)
    wa_s_t = params["wa"][:, :e].T              # [E, E]
    wa_v_t = params["wa"][:, e:].T              # [E, E]
    # Fold proj_1 into the vector half of the first scalar Linear (exact:
    # proj_1 has no bias and is only consumed via the spatial sum).
    wa_v_eff = w1_t @ wa_v_t                    # [E, E]

    wb = params["wb"]                           # [2O, E], interleaved outputs
    # De-interleave: even output rows -> scalar, odd -> gate; fold ScaledSiLU's
    # 1/0.6 into the weight (biases stay unscaled: matches silu(x)/0.6 @ W^T).
    wb_s = wb[0::2].T * (1.0 / 0.6)             # [E, O]
    wb_g = wb[1::2].T * (1.0 / 0.6)             # [E, O]
    bb_s = params["bb"][0::2]
    bb_g = params["bb"][1::2]
    w2_t = params["w2"].T                       # [E, O]

    if o_pad != o:
        colpad = ((0, 0), (0, o_pad - o))
        w2_t = jnp.pad(w2_t, colpad)
        wb_s = jnp.pad(wb_s, colpad)
        wb_g = jnp.pad(wb_g, colpad)
        bb_s = jnp.pad(bb_s, (0, o_pad - o))
        bb_g = jnp.pad(bb_g, (0, o_pad - o))

    return {
        "wa_s_t": wa_s_t.astype(compute_dtype),
        "wa_v_eff": wa_v_eff.astype(compute_dtype),
        "ba": params["ba"].reshape(1, e).astype(jnp.float32),
        "w2_t": w2_t.astype(compute_dtype),
        "wb_t": jnp.concatenate([wb_s, wb_g], axis=1).astype(compute_dtype),
        "bb": jnp.concatenate([bb_s, bb_g]).reshape(1, 2 * o_pad)
                 .astype(jnp.float32),
    }


# ---------------------------------------------------------------------------
# Pure-JAX f32 reference (mirrors the PyTorch forward literally).
# ---------------------------------------------------------------------------
def reference_forward(v, s, params):
    n = v.shape[0]
    vperm = jnp.transpose(v, (0, 2, 1))                         # [N, 3, E]
    v1 = jnp.transpose(vperm @ params["w1"].T, (0, 2, 1))       # [N, E, 3]
    v2 = jnp.transpose(vperm @ params["w2"].T, (0, 2, 1))       # [N, O, 3]
    cat = jnp.concatenate([s, jnp.sum(v1, axis=-1)], axis=-1)   # [N, 2E]
    h = cat @ params["wa"].T + params["ba"]
    h = jax.nn.silu(h) * (1.0 / 0.6)
    out = (h @ params["wb"].T + params["bb"]).reshape(n, -1, 2)  # [N, O, 2]
    sca, gate = out[..., 0], out[..., 1]
    return v2 * gate[..., None], sca


def _rel_err(a, b):
    a = np.asarray(jnp.asarray(a, jnp.float32), np.float64)
    b = np.asarray(jnp.asarray(b, jnp.float32), np.float64)
    return float(np.linalg.norm(a - b) / (np.linalg.norm(b) + 1e-12))


if __name__ == "__main__":
    N, E, O = 70, 32, 16     # N deliberately NOT tile-aligned (ragged last block)

    key = jax.random.PRNGKey(0)
    kp, kv, ks = jax.random.split(key, 3)
    params = init_params(kp, E, O)

    vectorial_feat = jax.random.normal(kv, (N, E, 3), jnp.float32)
    scalar_feat = jax.random.normal(ks, (N, E), jnp.float32)
    vec_ref, sca_ref = reference_forward(vectorial_feat, scalar_feat, params)

    # Config 1: multi-step grid + ragged last block, O unpadded (masked stores),
    # bf16 outputs.
    prepped = prepare_params(params)
    fwd = jax.jit(functools.partial(gated_equivariant_block, block_n=32))
    vec_out, sca_out = fwd(vectorial_feat, scalar_feat, prepped)
    jax.block_until_ready((vec_out, sca_out))
    assert vec_out.shape == (N, O, 3) and sca_out.shape == (N, O)
    # bf16 MXU inputs + bf16 outputs vs f32 reference: norm-relative criterion.
    assert _rel_err(vec_out, vec_ref) < 2e-2, _rel_err(vec_out, vec_ref)
    assert _rel_err(sca_out, sca_ref) < 2e-2, _rel_err(sca_out, sca_ref)

    # Config 2: lane-padded O (unmasked stores, 128-aligned scalar/gate split),
    # auto-sized tile.
    prepped_p = prepare_params(params, pad_out_lanes=True)
    fwd_p = jax.jit(functools.partial(gated_equivariant_block, out_dim=O))
    vec_out2, sca_out2 = fwd_p(vectorial_feat, scalar_feat, prepped_p)
    jax.block_until_ready((vec_out2, sca_out2))
    assert vec_out2.shape == (N, O, 3) and sca_out2.shape == (N, O)
    assert _rel_err(vec_out2, vec_ref) < 2e-2, _rel_err(vec_out2, vec_ref)
    assert _rel_err(sca_out2, sca_ref) < 2e-2, _rel_err(sca_out2, sca_ref)

    print("KERNEL_OK")
</pallas_src>

<mosaic_0001>
module attributes {stable_mosaic.version = 11 : i64} {
  func.func @_geb_kernel(%arg0: i32, %arg1: memref<3x32x32xbf16, #tpu.memory_space<vmem>>, %arg2: memref<32x32xbf16, #tpu.memory_space<vmem>>, %arg3: memref<32x32xbf16, #tpu.memory_space<vmem>>, %arg4: memref<32x32xbf16, #tpu.memory_space<vmem>>, %arg5: memref<1x32xf32, #tpu.memory_space<vmem>>, %arg6: memref<32x16xbf16, #tpu.memory_space<vmem>>, %arg7: memref<32x32xbf16, #tpu.memory_space<vmem>>, %arg8: memref<1x32xf32, #tpu.memory_space<vmem>>, %arg9: memref<3x32x16xbf16, #tpu.memory_space<vmem>>, %arg10: memref<32x16xbf16, #tpu.memory_space<vmem>>) attributes {dimension_semantics = [#tpu.dimension_semantics<parallel>], iteration_bounds = array<i64: 3>, scalar_prefetch = 0 : i64, scratch_operands = 0 : i64, tpu.core_type = #tpu.core_type<tc>, window_params = [{transform_indices = @transform_0, window_bounds = array<i64: 3, 32, 32>}, {transform_indices = @transform_1, window_bounds = array<i64: 32, 32>}, {pipeline_mode = #tpu.pipeline_mode<synchronous>, transform_indices = @transform_2, window_bounds = array<i64: 32, 32>}, {pipeline_mode = #tpu.pipeline_mode<synchronous>, transform_indices = @transform_3, window_bounds = array<i64: 32, 32>}, {pipeline_mode = #tpu.pipeline_mode<synchronous>, transform_indices = @transform_4, window_bounds = array<i64: 1, 32>}, {pipeline_mode = #tpu.pipeline_mode<synchronous>, transform_indices = @transform_5, window_bounds = array<i64: 32, 16>}, {pipeline_mode = #tpu.pipeline_mode<synchronous>, transform_indices = @transform_6, window_bounds = array<i64: 32, 32>}, {pipeline_mode = #tpu.pipeline_mode<synchronous>, transform_indices = @transform_7, window_bounds = array<i64: 1, 32>}, {transform_indices = @transform_8, window_bounds = array<i64: 3, 32, 16>}, {transform_indices = @transform_9, window_bounds = array<i64: 32, 16>}]} {
    %c0 = arith.constant 0 : index
    %c0_0 = arith.constant 0 : index
    %c0_1 = arith.constant 0 : index
    %0 = vector.load %arg1[%c0, %c0_0, %c0_1] : memref<3x32x32xbf16, #tpu.memory_space<vmem>>, vector<3x32x32xbf16>
    %1 = vector.shape_cast %0 : vector<3x32x32xbf16> to vector<96x32xbf16>
    %c0_2 = arith.constant 0 : index
    %c0_3 = arith.constant 0 : index
    %2 = vector.load %arg6[%c0_2, %c0_3] : memref<32x16xbf16, #tpu.memory_space<vmem>>, vector<32x16xbf16>
    %cst = arith.constant dense<0.000000e+00> : vector<96x16xf32>
    %3 = tpu.matmul %1, %2, %cst {dimension_numbers = #tpu.dot_dimension_numbers<[1], [0], [0], [1], [0, 0, 1, 1], [], []>} : vector<96x32xbf16>, vector<32x16xbf16>, vector<96x16xf32> -> vector<96x16xf32>
    %4 = vector.extract_strided_slice %0 {offsets = [0, 0, 0], sizes = [1, 32, 32], strides = [1, 1, 1]} : vector<3x32x32xbf16> to vector<1x32x32xbf16>
    %5 = vector.shape_cast %4 : vector<1x32x32xbf16> to vector<32x32xbf16>
    %6 = vector.extract_strided_slice %0 {offsets = [1, 0, 0], sizes = [1, 32, 32], strides = [1, 1, 1]} : vector<3x32x32xbf16> to vector<1x32x32xbf16>
    %7 = vector.shape_cast %6 : vector<1x32x32xbf16> to vector<32x32xbf16>
    %8 = arith.addf %5, %7 : vector<32x32xbf16>
    %9 = vector.extract_strided_slice %0 {offsets = [2, 0, 0], sizes = [1, 32, 32], strides = [1, 1, 1]} : vector<3x32x32xbf16> to vector<1x32x32xbf16>
    %10 = vector.shape_cast %9 : vector<1x32x32xbf16> to vector<32x32xbf16>
    %11 = arith.addf %8, %10 : vector<32x32xbf16>
    %c0_4 = arith.constant 0 : index
    %c0_5 = arith.constant 0 : index
    %12 = vector.load %arg2[%c0_4, %c0_5] : memref<32x32xbf16, #tpu.memory_space<vmem>>, vector<32x32xbf16>
    %c0_6 = arith.constant 0 : index
    %c0_7 = arith.constant 0 : index
    %13 = vector.load %arg3[%c0_6, %c0_7] : memref<32x32xbf16, #tpu.memory_space<vmem>>, vector<32x32xbf16>
    %cst_8 = arith.constant dense<0.000000e+00> : vector<32x32xf32>
    %14 = tpu.matmul %12, %13, %cst_8 {dimension_numbers = #tpu.dot_dimension_numbers<[1], [0], [0], [1], [0, 0, 1, 1], [], []>} : vector<32x32xbf16>, vector<32x32xbf16>, vector<32x32xf32> -> vector<32x32xf32>
    %c0_9 = arith.constant 0 : index
    %c0_10 = arith.constant 0 : index
    %15 = vector.load %arg4[%c0_9, %c0_10] : memref<32x32xbf16, #tpu.memory_space<vmem>>, vector<32x32xbf16>
    %cst_11 = arith.constant dense<0.000000e+00> : vector<32x32xf32>
    %16 = tpu.matmul %11, %15, %cst_11 {dimension_numbers = #tpu.dot_dimension_numbers<[1], [0], [0], [1], [0, 0, 1, 1], [], []>} : vector<32x32xbf16>, vector<32x32xbf16>, vector<32x32xf32> -> vector<32x32xf32>
    %17 = arith.addf %14, %16 : vector<32x32xf32>
    %c0_12 = arith.constant 0 : index
    %c0_13 = arith.constant 0 : index
    %18 = vector.load %arg5[%c0_12, %c0_13] : memref<1x32xf32, #tpu.memory_space<vmem>>, vector<1x32xf32>
    %19 = vector.broadcast %18 : vector<1x32xf32> to vector<32x32xf32>
    %20 = arith.addf %17, %19 : vector<32x32xf32>
    %cst_14 = arith.constant 0.000000e+00 : f32
    %21 = vector.broadcast %cst_14 : f32 to vector<32x32xf32>
    %22 = arith.subf %21, %20 : vector<32x32xf32>
    %23 = math.exp %22 : vector<32x32xf32>
    %cst_15 = arith.constant 1.000000e+00 : f32
    %24 = vector.broadcast %cst_15 : f32 to vector<32x32xf32>
    %25 = arith.addf %24, %23 : vector<32x32xf32>
    %26 = tpu.reciprocal %25 {approx = true} : vector<32x32xf32> -> vector<32x32xf32>
    %27 = arith.mulf %20, %26 : vector<32x32xf32>
    %28 = arith.truncf %27 : vector<32x32xf32> to vector<32x32xbf16>
    %c0_16 = arith.constant 0 : index
    %c0_17 = arith.constant 0 : index
    %29 = vector.load %arg7[%c0_16, %c0_17] : memref<32x32xbf16, #tpu.memory_space<vmem>>, vector<32x32xbf16>
    %cst_18 = arith.constant dense<0.000000e+00> : vector<32x32xf32>
    %30 = tpu.matmul %28, %29, %cst_18 {dimension_numbers = #tpu.dot_dimension_numbers<[1], [0], [0], [1], [0, 0, 1, 1], [], []>} : vector<32x32xbf16>, vector<32x32xbf16>, vector<32x32xf32> -> vector<32x32xf32>
    %c0_19 = arith.constant 0 : index
    %c0_20 = arith.constant 0 : index
    %31 = vector.load %arg8[%c0_19, %c0_20] : memref<1x32xf32, #tpu.memory_space<vmem>>, vector<1x32xf32>
    %32 = vector.broadcast %31 : vector<1x32xf32> to vector<32x32xf32>
    %33 = arith.addf %30, %32 : vector<32x32xf32>
    %34 = vector.extract_strided_slice %33 {offsets = [0, 0], sizes = [32, 16], strides = [1, 1]} : vector<32x32xf32> to vector<32x16xf32>
    %35 = vector.extract_strided_slice %33 {offsets = [0, 16], sizes = [32, 16], strides = [1, 1]} : vector<32x32xf32> to vector<32x16xf32>
    %36 = arith.truncf %34 : vector<32x16xf32> to vector<32x16xbf16>
    %c0_21 = arith.constant 0 : index
    %c0_22 = arith.constant 0 : index
    %37 = vector.load %arg10[%c0_21, %c0_22] : memref<32x16xbf16, #tpu.memory_space<vmem>>, vector<32x16xbf16>
    tpu.vector_store %arg10[%c0_21, %c0_22], %36 {strides = array<i32>} : memref<32x16xbf16, #tpu.memory_space<vmem>>, vector<32x16xbf16>,
    %38 = vector.shape_cast %3 : vector<96x16xf32> to vector<3x32x16xf32>
    %39 = vector.shape_cast %35 : vector<32x16xf32> to vector<1x32x16xf32>
    %40 = vector.broadcast %39 : vector<1x32x16xf32> to vector<3x32x16xf32>
    %41 = arith.mulf %38, %40 : vector<3x32x16xf32>
    %42 = arith.truncf %41 : vector<3x32x16xf32> to vector<3x32x16xbf16>
    %c0_23 = arith.constant 0 : index
    %c0_24 = arith.constant 0 : index
    %c0_25 = arith.constant 0 : index
    %43 = vector.load %arg9[%c0_23, %c0_24, %c0_25] : memref<3x32x16xbf16, #tpu.memory_space<vmem>>, vector<3x32x16xbf16>
    tpu.vector_store %arg9[%c0_23, %c0_24, %c0_25], %42 {strides = array<i32>} : memref<3x32x16xbf16, #tpu.memory_space<vmem>>, vector<3x32x16xbf16>,
    return
  }
  func.func @transform_0(%arg0: i32) -> (i32, i32, i32) {
    %c0_i32 = arith.constant 0 : i32
    %c0_i32_0 = arith.constant 0 : i32
    %c0_i32_1 = arith.constant 0 : i32
    return %c0_i32, %arg0, %c0_i32_0 : i32, i32, i32
  }
  func.func @transform_1(%arg0: i32) -> (i32, i32) {
    %c0_i32 = arith.constant 0 : i32
    %c0_i32_0 = arith.constant 0 : i32
    return %arg0, %c0_i32 : i32, i32
  }
  func.func @transform_2(%arg0: i32) -> (i32, i32) {
    %c0_i32 = arith.constant 0 : i32
    %c0_i32_0 = arith.constant 0 : i32
    %c0_i32_1 = arith.constant 0 : i32
    return %c0_i32, %c0_i32_0 : i32, i32
  }
  func.func @transform_3(%arg0: i32) -> (i32, i32) {
    %c0_i32 = arith.constant 0 : i32
    %c0_i32_0 = arith.constant 0 : i32
    %c0_i32_1 = arith.constant 0 : i32
    return %c0_i32, %c0_i32_0 : i32, i32
  }
  func.func @transform_4(%arg0: i32) -> (i32, i32) {
    %c0_i32 = arith.constant 0 : i32
    %c0_i32_0 = arith.constant 0 : i32
    %c0_i32_1 = arith.constant 0 : i32
    return %c0_i32, %c0_i32_0 : i32, i32
  }
  func.func @transform_5(%arg0: i32) -> (i32, i32) {
    %c0_i32 = arith.constant 0 : i32
    %c0_i32_0 = arith.constant 0 : i32
    %c0_i32_1 = arith.constant 0 : i32
    return %c0_i32, %c0_i32_0 : i32, i32
  }
  func.func @transform_6(%arg0: i32) -> (i32, i32) {
    %c0_i32 = arith.constant 0 : i32
    %c0_i32_0 = arith.constant 0 : i32
    %c0_i32_1 = arith.constant 0 : i32
    return %c0_i32, %c0_i32_0 : i32, i32
  }
  func.func @transform_7(%arg0: i32) -> (i32, i32) {
    %c0_i32 = arith.constant 0 : i32
    %c0_i32_0 = arith.constant 0 : i32
    %c0_i32_1 = arith.constant 0 : i32
    return %c0_i32, %c0_i32_0 : i32, i32
  }
  func.func @transform_8(%arg0: i32) -> (i32, i32, i32) {
    %c0_i32 = arith.constant 0 : i32
    %c0_i32_0 = arith.constant 0 : i32
    %c0_i32_1 = arith.constant 0 : i32
    return %c0_i32, %arg0, %c0_i32_0 : i32, i32, i32
  }
  func.func @transform_9(%arg0: i32) -> (i32, i32) {
    %c0_i32 = arith.constant 0 : i32
    %c0_i32_0 = arith.constant 0 : i32
    return %arg0, %c0_i32 : i32, i32
  }
}

</mosaic_0001>

<bundles_post_ra>
// kernel: gated_equivariant_block.1
= control target key start
LH: loop header
LB: loop body
LE: loop exit
PB: predicated region body
PF: predicated region fallthrough
CT: control target
= control target key end

     0   :  { %s2621_s0 = inlined_call_operand.vmem [shape: bf16[3,70,32], index: 0, kind: input, shape index: {}]   ;;  %s2622_s1 = inlined_call_operand.vmem [shape: bf16[70,32], index: 1, kind: input, shape index: {}]   ;;  %s2623_s2 = inlined_call_operand.vmem [shape: bf16[32,32], index: 2, kind: input, shape index: {}]   ;;  %s2624_s3 = inlined_call_operand.vmem [shape: bf16[32,32], index: 3, kind: input, shape index: {}]   ;;  %s2625_s4 = inlined_call_operand.vmem [shape: f32[1,32], index: 4, kind: input, shape index: {}]   ;;  %s2626_s5 = inlined_call_operand.vmem [shape: bf16[32,16], index: 5, kind: input, shape index: {}]   ;;  %s2627_s6 = inlined_call_operand.vmem [shape: bf16[32,32], index: 6, kind: input, shape index: {}]   ;;  %s2628_s7 = inlined_call_operand.vmem [shape: f32[1,32], index: 7, kind: input, shape index: {}]   ;;  %s2629_s8 = inlined_call_operand.vmem [shape: bf16[3,70,16], index: 8, kind: output, shape index: {0}]   ;;  %s2630_s9 = inlined_call_operand.vmem [shape: bf16[70,16], index: 9, kind: output, shape index: {1}]  }
   0x1   :  { %2631 = sst [smem:[#allocation5_spill]] %s2621_s0 }
   0x2   :  { %s2240_s30 = smov 0   ;;  %s2242_s10 = smov 0  }
   0x3   :  { %s2244_s11 = smov 0  }
   0x4 LB: > { %s2256_s12 = sadd.s32 4294967295, %s2091_s11   ;;  %s2259_s13 = sadd.s32 1, %s2091_s11   ;;  %s2091_s11 = sphi %s2244_s11, %s2651_s11   ;;  %s2087_s10 = sphi %s2242_s10, %s2650_s10   ;;  %s2083_s30 = sphi %s2240_s30, %s2649_s30  }
   0x5   : > { %s24_s14 = ssub.s32 %s2091_s11, %s2259_s13  ;;  %s27_s15 = sadd.s32 1, %s2087_s10 }
   0x6   : > { %p25_p0 = scmp.eq.s32.totalorder %s24_s14, 0  ;;  %p34_p1 = scmp.ne.s32.totalorder %s2087_s10, %s2083_s30 }
   0x7   : > { %p35_p2 = scmp.eq.s32.totalorder %s2091_s11, 0  ;;  %p216_p3 = scmp.eq.s32.totalorder %s2256_s12, 2 }
   0x8   : > { %s2269_s16 = scalar_select %p25_p0, %s2087_s10, %s27_s15  }
   0x9   : > { %p36_p4 = por %p35_p2, %p34_p1  ;;  %p2271_p5 = por %p216_p3, %p34_p1 }
   0xa   : > { %p1581_p6 = scmp.ge.s32.totalorder %s2091_s11, 3 }
   0xc   : > { %282 = sbr.rel (%p1581_p6) target bundleno = 68 (0x44), region = 40 }
  0x11   : > { %285 = sbr.rel (!%p36_p4) target bundleno = 68 (0x44), region = 44  ;;  %s287_s18 = sand.u32 (%p36_p4), 1, %s2087_s10  }
  0x12   : > { %s1582_s19 = sshll.u32 (%p36_p4), %s2091_s11, 2  ;;  %s1736_s20 = smul.u32 (%p36_p4), 48, %s287_s18 }
  0x13   : > { %s291_s21 = ssub.s32 (%p36_p4), 9, %s1582_s19  ;;  %s1705_s22 = sshll.u32 (%p36_p4), %s2091_s11, 4 }
  0x14   : > { %p292_p7 = scmp.lt.s32.totalorder (%p36_p4), %s291_s21, 4  ;;  %s2633_s0 = sld [smem:[#allocation5_spill]] (%p36_p4) }
  0x15   : > { %s2287_s27 = scalar_lea.vmem (%p36_p4), [#allocation2], %s1736_s20  }
  0x16   : > { %s2653_s21 = smov (!%p292_p7, %s291_s21), 4 }
  0x17   : > { %s294_s26 = smul.u32 12, %s2653_s21 }
  0x19   : > { %p1585_p8 = scmp.eq.s32.totalorder %s294_s26, 0 }
  0x1a   : > { %s2282_s25 = scalar_lea.vmem %s2633_s0, %s1705_s22   ;;  %s2290_s28 = sshrl.u32 (!%p1585_p8), %s2653_s21, 2 }
  0x1b   : > { %300 = sbr.rel (%p1585_p8) target bundleno = 68 (0x44), region = 48  ;;  %p1586_p9 = scmp.le.s32.totalorder (!%p1585_p8), %s2290_s28, 0 }
  0x20   : > { %1464 = sbr.rel (%p1586_p9) target bundleno = 50 (0x32), region = 304  ;;  %s2634_s29 = smov (!%p1586_p9), %s2287_s27 }
  0x21   : > { %s2635_s14 = smov (!%p1586_p9), %s2282_s25  ;;  %s2299_s15 = smov (!%p1586_p9), 0  }
  0x22   : > { %s2301_s18 = smov (!%p1586_p9), 0  }
  0x25 LB: >> { %v317_v0 = vld [vmem:[%s2099_s14] sm:$0xf]  ;;  %v319_v1 = vld [vmem:[%s2099_s14 + $0x4] sm:$0xf]  ;;  %v321_v2 = vld [vmem:[%s2099_s14 + $0x8] sm:$0xf]  ;;  %s2107_s18 = sphi %s2301_s18, %s311_s18   ;;  %s2103_s15 = sphi %s2299_s15, %s2638_s15   ;;  %s2099_s14 = sphi %s2635_s14, %s2637_s14   ;;  %s2095_s29 = sphi %s2634_s29, %s2636_s29  }
  0x26   : >> { %318 = vst [vmem:[%s2095_s29] sm:$0xf] %v317_v0  ;;  %v323_v3 = vld [vmem:[%s2099_s14 + $0xc] sm:$0xf]  ;;  %s341_s19 = sadd.s32 1, %s2103_s15  ;;  %v325_v4 = vld [vmem:[%s2099_s14 + $0x24] sm:$0xf] }
  0x27   : >> { %320 = vst [vmem:[%s2095_s29 + $0x4] sm:$0xf] %v319_v1  ;;  %p342_p10 = scmp.ge.s32.totalorder %s341_s19, %s2290_s28  ;;  %v327_v5 = vld [vmem:[%s2099_s14 + $0x28] sm:$0xf]  ;;  %v329_v6 = vld [vmem:[%s2099_s14 + $0x2c] sm:$0xf] }
  0x28   : >> { %322 = vst [vmem:[%s2095_s29 + $0x8] sm:$0xf] %v321_v2  ;;  %v331_v7 = vld [vmem:[%s2099_s14 + $0x30] sm:$0xf]  ;;  %v333_v8 = vld [vmem:[%s2099_s14 + $0x48] sm:$0xf] }
  0x29   : >> { %324 = vst [vmem:[%s2095_s29 + $0xc] sm:$0xf] %v323_v3  ;;  %s2655_s19 = smov (%p342_p10, %s341_s19), 0  ;;  %v335_v9 = vld [vmem:[%s2099_s14 + $0x4c] sm:$0xf]  ;;  %s311_s18 = sadd.s32 1, %s2107_s18  }
  0x2a   : >> { %326 = vst [vmem:[%s2095_s29 + $0x10] sm:$0xf] %v325_v4  ;;  %s1587_s20 = sshll.u32 %s2655_s19, 4  ;;  %v337_v10 = vld [vmem:[%s2099_s14 + $0x50] sm:$0xf]  ;;  %p310_p11 = scmp.ge.s32.totalorder %s311_s18, %s2290_s28 }
  0x2b   : >> { %328 = vst [vmem:[%s2095_s29 + $0x14] sm:$0xf] %v327_v5  ;;  %s346_s22 = scalar_lea.vmem %s2282_s25, %s1587_s20   ;;  %s347_s23 = scalar_lea.vmem %s2287_s27, %s1587_s20 [#allocation2]   ;;  %v339_v11 = vld [vmem:[%s2099_s14 + $0x54] sm:$0xf] }
  0x2c   : >> { %330 = vst [vmem:[%s2095_s29 + $0x18] sm:$0xf] %v329_v6  ;;  %s2637_s14 = smov %s346_s22  ;;  %s2638_s15 = smov %s2655_s19 }
  0x2d   : >> { %332 = vst [vmem:[%s2095_s29 + $0x1c] sm:$0xf] %v331_v7  ;;  %313 = sbr.rel (!%p310_p11) target bundleno = 37 (0x25), region = 310 }
  0x2e   : >> { %334 = vst [vmem:[%s2095_s29 + $0x20] sm:$0xf] %v333_v8 }
  0x2f   : >> { %336 = vst [vmem:[%s2095_s29 + $0x24] sm:$0xf] %v335_v9 }
  0x30   : >> { %338 = vst [vmem:[%s2095_s29 + $0x28] sm:$0xf] %v337_v10 }
  0x31   : >> { %340 = vst [vmem:[%s2095_s29 + $0x2c] sm:$0xf] %v339_v11  ;;  %s2636_s29 = smov %s347_s23 }
  0x32 PF: > { %s2337_s24 = sand.u32 3, %s2653_s21   ;;  %s1706_s26 = sshll.u32 %s2290_s28, 4 }
  0x33   : > { %s2341_s20 = scalar_lea.vmem %s2282_s25, %s1706_s26   ;;  %s2344_s0 = scalar_lea.vmem %s2287_s27, %s1706_s26 [#allocation2]  }
  0x34   : > { %p1592_p12 = scmp.le.s32.totalorder %s2337_s24, 0 }
  0x35   : > { %s2639_s18 = smov (!%p1592_p12), %s2344_s0  ;;  %s2113_s19 = smov (!%p1592_p12), %s2341_s20  }
  0x36   : > { %1478 = sbr.rel (%p1592_p12) target bundleno = 68 (0x44), region = 315  ;;  %s2117_s29 = smov (!%p1592_p12), 0  }
  0x37   : > { %s2121_s14 = smov (!%p1592_p12), 0  }
  0x3b LB: >> { %v364_v12 = vld [vmem:[%s2115_s19] sm:$0xf]  ;;  %v366_v13 = vld [vmem:[%s2115_s19 + $0x24] sm:$0xf]  ;;  %v368_v14 = vld [vmem:[%s2115_s19 + $0x48] sm:$0xf]  ;;  %s2123_s14 = sphi %s2121_s14, %s358_s14   ;;  %s2119_s29 = sphi %s2117_s29, %s2118_s29   ;;  %s2115_s19 = sphi %s2113_s19, %s375_s19   ;;  %s2111_s18 = sphi %s2639_s18, %s376_s18  }
  0x3c   : >> { %365 = vst [vmem:[%s2111_s18] sm:$0xf] %v364_v12  ;;  %s370_s21 = sadd.s32 1, %s2119_s29  ;;  %s358_s14 = sadd.s32 1, %s2123_s14  }
  0x3d   : >> { %367 = vst [vmem:[%s2111_s18 + $0x10] sm:$0xf] %v366_v13  ;;  %p371_p13 = scmp.ge.s32.totalorder %s370_s21, %s2337_s24  ;;  %p357_p0 = scmp.ge.s32.totalorder %s358_s14, %s2337_s24 }
  0x3e   : >> { %369 = vst [vmem:[%s2111_s18 + $0x20] sm:$0xf] %v368_v14 }
  0x3f   : >> { %s2657_s21 = smov (%p371_p13, %s370_s21), 0  ;;  %360 = sbr.rel (!%p357_p0) target bundleno = 59 (0x3b), region = 321 }
  0x40   : >> { %s1593_s25 = sshll.u32 %s2657_s21, 2  ;;  %s2118_s29 = smov %s2657_s21  }
  0x41   : >> { %s375_s19 = scalar_lea.vmem %s2341_s20, %s1593_s25   ;;  %s376_s18 = scalar_lea.vmem %s2344_s0, %s1593_s25 [#allocation2]  }
  0x44 PF: > { %p1595_p1 = scmp.ge.s32.totalorder %s2091_s11, 1  ;;  %p510_p2 = scmp.lt.s32.totalorder %s2091_s11, 4 }
  0x46   : > { %p511_p3 = pnand %p1595_p1, %p510_p2 }
  0x47   : > { %s517_s15 = sand.u32 (!%p511_p3), 1, %s2083_s30   ;;  %s2382_s19 = sshll.u32 (!%p511_p3), %s2256_s12, 2 }
  0x48   : > { %514 = sbr.rel (%p511_p3) target bundleno = 639 (0x27f), region = 110  ;;  %p574_p4 = scmp.lt.s32.totalorder (!%p511_p3), %s2382_s19, 8 }
  0x49   : > { %s2366_s22 = smul.u32 (!%p511_p3), 48, %s517_s15  ;;  %s2189_s0 = smov (!%p511_p3), 112  }
  0x4b   : > { %s2378_s18 = scalar_lea.vmem (!%p511_p3), [#allocation2], %s2366_s22  ;;  %s2454_s30 = scalar_lea.vmem (!%p511_p3), [#allocation3], %s2366_s22  }
  0x4d   : > { %v1715_v15 = vld [vmem:[%s2626_s5 + $0x8] sm:$0xff]  ;;  %v1714_v16 = vld [vmem:[%s2626_s5] sm:$0xff]  ;;  %vm652_vm0 = vcmask 261120   ;;  %s575_s27 = scalar_select %p574_p4, %s2382_s19, 8  ;;  %vm919_vm1 = vcmask 125952  }
  0x4e   : > { %1730 = vmatpush.bf16.msra.mxu1 %v1715_v15  ;;  %1731 = vmatpush.bf16.msra.mxu2 %v1715_v15  ;;  %v1719_v17 = vld [vmem:[%s2623_s2 + $0x8] sm:$0xff]  ;;  %v594_v19 = vld [vmem:[%s2378_s18] sm:$0xff]   ;;  %v598_v22 = vld [vmem:[%s2378_s18 + $0x10] sm:$0xff]   ;;  %s1724_s22 = sshll.u32 (%p2271_p5), %s2256_s12, 4 }
  0x4f   : > { %v1721_v18 = vld [vmem:[%s2624_s3 + $0x8] sm:$0xff]  ;;  %1732 = vmatpush.bf16.msra.mxu3 %v1715_v15  ;;  %677 = vmatpush.bf16.msra.mxu0 %v1715_v15  ;;  %v1712_v21 = vld [vmem:[%s2378_s18 + $0x20] sm:$0xff]  ;;  %v710_v23 = vunpack.c.l.bf16 %v594_v19  ;;  %v711_v24 = vunpack.c.h.bf16 %v594_v19  ;;  %v714_v25 = vunpack.c.l.bf16 %v598_v22  ;;  %v715_v26 = vunpack.c.h.bf16 %v598_v22  ;;  %s1598_s28 = sshll.u32 %s575_s27, 2  ;;  %s2491_s24 = scalar_lea.vmem (%p2271_p5), %s2629_s8, %s1724_s22  }
  0x50   : > { %v1711_v20 = vld [vmem:[%s2378_s18 + $0x18] sm:$0xff]  ;;  %v1718_v27 = vld [vmem:[%s2623_s2] sm:$0xff]  ;;  %v596_v38 = vld [vmem:[%s2378_s18 + $0x8] sm:$0xff]   ;;  %s577_s11 = scalar_lea.vmem %s2622_s1, %s1598_s28  ;;  %s1596_s28 = sshll.u32 %s517_s15, 4 }
  0x51   : > { %v1720_v28 = vld [vmem:[%s2624_s3] sm:$0xff]  ;;  %v718_v29 = vadd.f32 %v714_v25, %v710_v23  ;;  %v719_v30 = vadd.f32 %v715_v26, %v711_v24  ;;  %v600_v39 = vld [vmem:[%s2378_s18 + $0x18] sm:$0xff]   ;;  %v712_v40 = vunpack.c.l.bf16 %v596_v38  ;;  %v713_v41 = vunpack.c.h.bf16 %v596_v38  ;;  %v604_v52 = vld [vmem:[%s2378_s18 + $0x28] sm:$0xff]   ;;  %s2442_s23 = scalar_lea.vmem [#allocation4], %s1596_s28   ;;  %s988_s15 = ssub.s32 (%p2271_p5), 9, %s2382_s19 }
  0x52   : > { %1733 = vmatpush.bf16.msra.mxu1 %v1714_v16  ;;  %1734 = vmatpush.bf16.msra.mxu2 %v1714_v16  ;;  %v602_v31 = vld [vmem:[%s2378_s18 + $0x20] sm:$0xff]   ;;  %v716_v44 = vunpack.c.l.bf16 %v600_v39  ;;  %v717_v45 = vunpack.c.h.bf16 %v600_v39  ;;  %v732_v55 = vunpack.c.l.bf16 %v604_v52  ;;  %v733_v56 = vunpack.c.h.bf16 %v604_v52  ;;  %v1717_v60 = vld [vmem:[%s577_s11 + $0x8] sm:$0xff]  ;;  %p989_p6 = scmp.lt.s32.totalorder (%p2271_p5), %s988_s15, 4 }
  0x53   : > { %1735 = vmatpush.bf16.msra.mxu3 %v1714_v16  ;;  %678 = vmatpush.bf16.msra.mxu0 %v1714_v16  ;;  %v722_v32 = vpack.c.bf16 %v718_v29, %v718_v29  ;;  %v723_v33 = vpack.c.bf16 %v719_v30, %v719_v30  ;;  %v730_v36 = vunpack.c.l.bf16 %v602_v31  ;;  %v731_v37 = vunpack.c.h.bf16 %v602_v31  ;;  %v1716_v47 = vld [vmem:[%s577_s11] sm:$0xff]  ;;  %v1713_v62 = vld [vmem:[%s2378_s18 + $0x28] sm:$0xff] }
  0x54   : > { %v720_v48 = vadd.f32 %v716_v44, %v712_v40  ;;  %v721_v49 = vadd.f32 %v717_v45, %v713_v41  ;;  %v1723_v3 = vld [vmem:[%s2627_s6 + $0x8] sm:$0xff]  ;;  %v1955_v4 = vld [vmem:[%s2625_s4] ss:$0 sm:$0xff] }
  0x55   : > { %1634 = vmatmul.msk.bf16.vlgmr.msra.gmra.mxu1 %vm652_vm0, %v1711_v20  ;;  %1635 = vmatmul.msk.bf16.vlgmr.msra.gmra.mxu2 %vm652_vm0, %v1712_v21  ;;  %v726_v34 = vunpack.c.l.bf16 %v722_v32  ;;  %v727_v35 = vunpack.c.l.bf16 %v723_v33  ;;  %v1722_v6 = vld [vmem:[%s2627_s6] sm:$0xff]  ;;  %v1709_v40 = vld [vmem:[%s2378_s18 + $0x8] sm:$0xff] }
  0x56   : > { %823 = vmatpush.bf16.msrb.mxu2 %v1719_v17  ;;  %776 = vmatpush.bf16.msrb.mxu1 %v1721_v18  ;;  %v724_v50 = vpack.c.bf16 %v720_v48, %v720_v48  ;;  %v725_v51 = vpack.c.bf16 %v721_v49, %v721_v49  ;;  %v1708_v24 = vld [vmem:[%s2378_s18] sm:$0xff]  ;;  %v1710_v49 = vld [vmem:[%s2378_s18 + $0x10] sm:$0xff] }
  0x57   : > { %v734_v42 = vadd.f32 %v730_v36, %v726_v34  ;;  %v735_v43 = vadd.f32 %v731_v37, %v727_v35  ;;  %1636 = vmatmul.msk.bf16.vlgmr.msra.gmra.mxu3 %vm652_vm0, %v1713_v62  ;;  %1631 = vmatmul.msk.bf16.vlgmr.msra.gmra.mxu0 %vm652_vm0, %v1708_v24  ;;  %v1956_v52 = vld [vmem:[%s2628_s7] ss:$0 sm:$0xff] }
  0x58   : > { %v728_v53 = vunpack.c.l.bf16 %v724_v50  ;;  %v729_v54 = vunpack.c.l.bf16 %v725_v51  ;;  %902 = vmatpush.bf16.msrb.mxu3 %v1723_v3 }
  0x59   : > { %v738_v46 = vpack.c.bf16 %v735_v43, %v734_v42 }
  0x5a   : > { %824 = vmatpush.bf16.msrb.mxu2 %v1718_v27  ;;  %777 = vmatpush.bf16.msrb.mxu1 %v1720_v28  ;;  %v736_v57 = vadd.f32 %v732_v55, %v728_v53  ;;  %v737_v58 = vadd.f32 %v733_v56, %v729_v54 }
  0x5c   : > { %v739_v59 = vpack.c.bf16 %v737_v58, %v736_v57  ;;  %903 = vmatpush.bf16.msrb.mxu3 %v1722_v6 }
  0x65   : > { %1645 = vmatmul.msk.bf16.vlgmr.msrb.gmra.mxu1 %vm652_vm0, %v738_v46  ;;  %1663 = vmatmul.msk.bf16.vlgmr.msrb.gmra.mxu2 %vm652_vm0, %v1716_v47 }
  0x67   : > { %1632 = vmatmul.msk.bf16.gmra.mxu0 %vm652_vm0, %v1709_v40 }
  0x75   : > { %1646 = vmatmul.msk.bf16.gmra.mxu1 %vm652_vm0, %v739_v59  ;;  %1664 = vmatmul.msk.bf16.gmra.mxu2 %vm652_vm0, %v1717_v60 }
  0x77   : > { %1633 = vmatmul.msk.bf16.gmra.mxu0 %vm652_vm0, %v1710_v49 }
  0xd2   : > { %v2408_v61 = vpop.f32.mrf.mxu1 }
  0xd8   : > { %v2412_v63 = vpop.f32.mrf.mxu2 }
  0xda   : > { %v2414_v0 = vpop.f32.mrf.mxu1  ;;  %v705_v50 = vpop.f32.mrf.mxu3 }
  0xe0   : > { %v2416_v1 = vpop.f32.mrf.mxu2 }
  0xe2   : > { %v779_v2 = vpop.f32.mrf.mxu1  ;;  %v2435_v51 = vpop.f32.mrf.mxu3 }
  0xe8   : > { %v826_v5 = vpop.f32.mrf.mxu2 }
  0xe9   : > { %v827_v7 = vadd.f32 %v826_v5, %v779_v2  ;;  %v680_v5 = vpop.f32.mrf.mxu0 }
  0xea   : > { %v781_v9 = vpop.f32.mrf.mxu1 }
  0xeb   : > { %v840_v8 = vadd.f32 %v1955_v4, %v827_v7 }
  0xed   : > { %v844_v10 = vsub.f32 0.0, %v840_v8 }
  0xef   : > { %v848_v11 = vmul.f32 1.442695, %v844_v10 }
  0xf0   : > { %v828_v12 = vpop.f32.mrf.mxu2 }
  0xf1   : > { %v829_v13 = vadd.f32 %v828_v12, %v781_v9  ;;  %1957 = vpow2.f32 %v848_v11  ;;  %v682_v6 = vpop.f32.mrf.mxu0 }
  0xf2   : > { %v784_v16 = vpop.f32.mrf.mxu1 }
  0xf3   : > { %v841_v14 = vadd.f32 %v1955_v4, %v829_v13 }
  0xf5   : > { %v845_v15 = vsub.f32 0.0, %v841_v14 }
  0xf7   : > { %v850_v17 = vmul.f32 1.442695, %v845_v15  ;;  %v1958_v19 = vpop.eup %1957 }
  0xf8   : > { %v831_v18 = vpop.f32.mrf.mxu2  ;;  %v856_v22 = vadd.f32 1.0, %v1958_v19 }
  0xf9   : > { %1959 = vpow2.f32 %v850_v17  ;;  %v832_v20 = vadd.f32 %v831_v18, %v784_v16  ;;  %v685_v7 = vpop.f32.mrf.mxu0 }
  0xfa   : > { %1961 = vrcp.f32 %v856_v22  ;;  %v786_v28 = vpop.f32.mrf.mxu1 }
  0xfb   : > { %v842_v21 = vadd.f32 %v1955_v4, %v832_v20 }
  0xfd   : > { %v846_v23 = vsub.f32 0.0, %v842_v21 }
  0xff   : > { %v1960_v25 = vpop.eup %1959  ;;  %v852_v26 = vmul.f32 1.442695, %v846_v23 }
 0x100   : > { %v857_v27 = vadd.f32 1.0, %v1960_v25  ;;  %v833_v29 = vpop.f32.mrf.mxu2  ;;  %v1962_v33 = vpop.eup %1961 }
 0x101   : > { %v834_v30 = vadd.f32 %v833_v29, %v786_v28  ;;  %v864_v37 = vmul.f32 %v1962_v33, %v840_v8  ;;  %v687_v8 = vpop.f32.mrf.mxu0 }
 0x102   : > { %1963 = vrcp.f32 %v857_v27 }
 0x103   : > { %1965 = vpow2.f32 %v852_v26  ;;  %v843_v31 = vadd.f32 %v1955_v4, %v834_v30 }
 0x105   : > { %v847_v32 = vsub.f32 0.0, %v843_v31 }
 0x107   : > { %v854_v34 = vmul.f32 1.442695, %v847_v32 }
 0x108   : > { %v1964_v35 = vpop.eup %1963 }
 0x109   : > { %v1966_v36 = vpop.eup %1965  ;;  %v865_v38 = vmul.f32 %v1964_v35, %v841_v14  ;;  %1967 = vpow2.f32 %v854_v34  ;;  %v690_v9 = vpop.f32.mrf.mxu0 }
 0x10a   : > { %v858_v41 = vadd.f32 1.0, %v1966_v36 }
 0x10b   : > { %v868_v39 = vpack.c.bf16 %v865_v38, %v864_v37 }
 0x10c   : > { %1969 = vrcp.f32 %v858_v41 }
 0x10d   : > { %1673 = vmatmul.msk.bf16.vlgmr.msrb.gmra.mxu3 %vm652_vm0, %v868_v39 }
 0x10f   : > { %v1968_v42 = vpop.eup %1967 }
 0x110   : > { %v859_v43 = vadd.f32 1.0, %v1968_v42 }
 0x111   : > { %v692_v17 = vpop.f32.mrf.mxu0 }
 0x112   : > { %1971 = vrcp.f32 %v859_v43  ;;  %v1970_v44 = vpop.eup %1969 }
 0x113   : > { %v866_v46 = vmul.f32 %v1970_v44, %v842_v21 }
 0x118   : > { %v1972_v45 = vpop.eup %1971 }
 0x119   : > { %v867_v47 = vmul.f32 %v1972_v45, %v843_v31 }
 0x11b   : > { %v869_v48 = vpack.c.bf16 %v867_v47, %v866_v46 }
 0x11d   : > { %1674 = vmatmul.msk.bf16.gmra.mxu3 %vm652_vm0, %v869_v48 }
 0x190   : > { %v905_v53 = vpop.f32.mrf.mxu3 }
 0x191   : > { %v906_v54 = vadd.f32 %v1956_v52, %v905_v53 }
 0x193   : > { %v915_v55 = vpack.c.bf16 %v906_v54, %v906_v54  ;;  %928 = vrot.lane.b32.xlu0 %v906_v54, %s2189_s0 }
 0x195   : > { %920 = vst.msk [vmem:[%s2442_s23] sm:$0xf] %vm919_vm1, %v915_v55 }
 0x198   : > { %v907_v56 = vpop.f32.mrf.mxu3 }
 0x199   : > { %v908_v57 = vadd.f32 %v1956_v52, %v907_v56 }
 0x19b   : > { %v916_v58 = vpack.c.bf16 %v908_v57, %v908_v57  ;;  %930 = vrot.lane.b32.xlu0 %v908_v57, %s2189_s0 }
 0x19d   : > { %921 = vst.msk [vmem:[%s2442_s23 + $0x4] sm:$0xf] %vm919_vm1, %v916_v58 }
 0x1a0   : > { %v910_v59 = vpop.f32.mrf.mxu3 }
 0x1a1   : > { %v911_v60 = vadd.f32 %v1956_v52, %v910_v59 }
 0x1a3   : > { %v917_v62 = vpack.c.bf16 %v911_v60, %v911_v60  ;;  %932 = vrot.lane.b32.xlu1 %v911_v60, %s2189_s0 }
 0x1a5   : > { %922 = vst.msk [vmem:[%s2442_s23 + $0x8] sm:$0xf] %vm919_vm1, %v917_v62 }
 0x1a8   : > { %v912_v2 = vpop.f32.mrf.mxu3 }
 0x1a9   : > { %v913_v3 = vadd.f32 %v1956_v52, %v912_v2 }
 0x1ab   : > { %v918_v4 = vpack.c.bf16 %v913_v3, %v913_v3  ;;  %934 = vrot.lane.b32.xlu1 %v913_v3, %s2189_s0 }
 0x1ad   : > { %923 = vst.msk [vmem:[%s2442_s23 + $0xc] sm:$0xf] %vm919_vm1, %v918_v4 }
 0x205   : > { %v929_v10 = vpop.permute.xlu0 %928 }
 0x206   : > { %v940_v11 = vmul.f32 %v929_v10, %v680_v5  ;;  %v944_v12 = vmul.f32 %v929_v10, %v690_v9  ;;  %v948_v13 = vmul.f32 %v929_v10, %v2412_v63 }
 0x208   : > { %v952_v14 = vpack.c.bf16 %v940_v11, %v940_v11  ;;  %v956_v15 = vpack.c.bf16 %v944_v12, %v944_v12  ;;  %v960_v16 = vpack.c.bf16 %v948_v13, %v948_v13 }
 0x20a   : > { %964 = vst.msk [vmem:[%s2454_s30] sm:$0xf] %vm919_vm1, %v952_v14 }
 0x20b   : > { %968 = vst.msk [vmem:[%s2454_s30 + $0x10] sm:$0xf] %vm919_vm1, %v956_v15 }
 0x20c   : > { %972 = vst.msk [vmem:[%s2454_s30 + $0x20] sm:$0xf] %vm919_vm1, %v960_v16 }
 0x20d   : > { %v931_v18 = vpop.permute.xlu0 %930 }
 0x20e   : > { %v941_v63 = vmul.f32 %v931_v18, %v682_v6  ;;  %v945_v19 = vmul.f32 %v931_v18, %v692_v17  ;;  %v949_v20 = vmul.f32 %v931_v18, %v2416_v1 }
 0x210   : > { %v953_v21 = vpack.c.bf16 %v941_v63, %v941_v63  ;;  %v957_v22 = vpack.c.bf16 %v945_v19, %v945_v19  ;;  %v961_v23 = vpack.c.bf16 %v949_v20, %v949_v20 }
 0x212   : > { %965 = vst.msk [vmem:[%s2454_s30 + $0x4] sm:$0xf] %vm919_vm1, %v953_v21 }
 0x213   : > { %969 = vst.msk [vmem:[%s2454_s30 + $0x14] sm:$0xf] %vm919_vm1, %v957_v22 }
 0x214   : > { %973 = vst.msk [vmem:[%s2454_s30 + $0x24] sm:$0xf] %vm919_vm1, %v961_v23 }
 0x215   : > { %v933_v24 = vpop.permute.xlu1 %932 }
 0x216   : > { %v942_v25 = vmul.f32 %v933_v24, %v685_v7  ;;  %v946_v26 = vmul.f32 %v933_v24, %v2408_v61  ;;  %v950_v27 = vmul.f32 %v933_v24, %v705_v50 }
 0x218   : > { %v954_v28 = vpack.c.bf16 %v942_v25, %v942_v25  ;;  %v958_v1 = vpack.c.bf16 %v946_v26, %v946_v26  ;;  %v962_v29 = vpack.c.bf16 %v950_v27, %v950_v27 }
 0x21a   : > { %966 = vst.msk [vmem:[%s2454_s30 + $0x8] sm:$0xf] %vm919_vm1, %v954_v28 }
 0x21b   : > { %970 = vst.msk [vmem:[%s2454_s30 + $0x18] sm:$0xf] %vm919_vm1, %v958_v1 }
 0x21c   : > { %974 = vst.msk [vmem:[%s2454_s30 + $0x28] sm:$0xf] %vm919_vm1, %v962_v29 }
 0x21d   : > { %v935_v30 = vpop.permute.xlu1 %934 }
 0x21e   : > { %v943_v31 = vmul.f32 %v935_v30, %v687_v8  ;;  %v947_v32 = vmul.f32 %v935_v30, %v2414_v0  ;;  %v951_v33 = vmul.f32 %v935_v30, %v2435_v51 }
 0x220   : > { %v955_v34 = vpack.c.bf16 %v943_v31, %v943_v31  ;;  %v959_v61 = vpack.c.bf16 %v947_v32, %v947_v32  ;;  %v963_v35 = vpack.c.bf16 %v951_v33, %v951_v33  ;;  %986 = sbr.rel (!%p2271_p5) target bundleno = 594 (0x252), region = 118 }
 0x222   : > { %967 = vst.msk [vmem:[%s2454_s30 + $0xc] sm:$0xf] %vm919_vm1, %v955_v34 }
 0x223   : > { %971 = vst.msk [vmem:[%s2454_s30 + $0x1c] sm:$0xf] %vm919_vm1, %v959_v61 }
 0x224   : > { %975 = vst.msk [vmem:[%s2454_s30 + $0x2c] sm:$0xf] %vm919_vm1, %v963_v35 }
 0x225   : > { %s2659_s15 = smov (!%p989_p6, %s988_s15), 4 }
 0x226   : > { %s991_s26 = smul.u32 12, %s2659_s15 }
 0x228   : > { %p1679_p7 = scmp.eq.s32.totalorder %s991_s26, 0 }
 0x229   : > { %s2497_s20 = sshrl.u32 (!%p1679_p7), %s2659_s15, 2 }
 0x22a   : > { %997 = sbr.rel (%p1679_p7) target bundleno = 594 (0x252), region = 122  ;;  %p1680_p8 = scmp.le.s32.totalorder (!%p1679_p7), %s2497_s20, 0 }
 0x22f   : > { %1492 = sbr.rel (%p1680_p8) target bundleno = 577 (0x241), region = 326  ;;  %s2640_s29 = smov (!%p1680_p8), %s2491_s24 }
 0x230   : > { %s2641_s14 = smov (!%p1680_p8), %s2454_s30  ;;  %s2506_s21 = smov (!%p1680_p8), 0  }
 0x231   : > { %s2508_s25 = smov (!%p1680_p8), 0  }
 0x234 LB: >> { %v1014_v0 = vld [vmem:[%s2131_s14] sm:$0xf]  ;;  %v1016_v36 = vld [vmem:[%s2131_s14 + $0x4] sm:$0xf]  ;;  %v1018_v37 = vld [vmem:[%s2131_s14 + $0x8] sm:$0xf]  ;;  %s2139_s25 = sphi %s2508_s25, %s1008_s25   ;;  %s2135_s21 = sphi %s2506_s21, %s2644_s21   ;;  %s2131_s14 = sphi %s2641_s14, %s2643_s14   ;;  %s2127_s29 = sphi %s2640_s29, %s2642_s29  }
 0x235   : >> { %1015 = vst [vmem:[%s2127_s29] sm:$0xf] %v1014_v0  ;;  %v1020_v38 = vld [vmem:[%s2131_s14 + $0xc] sm:$0xf]  ;;  %s1038_s27 = sadd.s32 1, %s2135_s21  ;;  %v1022_v39 = vld [vmem:[%s2131_s14 + $0x10] sm:$0xf] }
 0x236   : >> { %1017 = vst [vmem:[%s2127_s29 + $0x4] sm:$0xf] %v1016_v36  ;;  %p1039_p9 = scmp.ge.s32.totalorder %s1038_s27, %s2497_s20  ;;  %v1024_v40 = vld [vmem:[%s2131_s14 + $0x14] sm:$0xf]  ;;  %v1026_v41 = vld [vmem:[%s2131_s14 + $0x18] sm:$0xf] }
 0x237   : >> { %1019 = vst [vmem:[%s2127_s29 + $0x8] sm:$0xf] %v1018_v37  ;;  %v1028_v42 = vld [vmem:[%s2131_s14 + $0x1c] sm:$0xf]  ;;  %v1030_v43 = vld [vmem:[%s2131_s14 + $0x20] sm:$0xf] }
 0x238   : >> { %1021 = vst [vmem:[%s2127_s29 + $0xc] sm:$0xf] %v1020_v38  ;;  %s2661_s27 = smov (%p1039_p9, %s1038_s27), 0  ;;  %v1032_v44 = vld [vmem:[%s2131_s14 + $0x24] sm:$0xf]  ;;  %s1008_s25 = sadd.s32 1, %s2139_s25  }
 0x239   : >> { %1023 = vst [vmem:[%s2127_s29 + $0x24] sm:$0xf] %v1022_v39  ;;  %s1681_s28 = sshll.u32 %s2661_s27, 4  ;;  %v1034_v45 = vld [vmem:[%s2131_s14 + $0x28] sm:$0xf]  ;;  %p1007_p10 = scmp.ge.s32.totalorder %s1008_s25, %s2497_s20 }
 0x23a   : >> { %1025 = vst [vmem:[%s2127_s29 + $0x28] sm:$0xf] %v1024_v40  ;;  %s1043_s0 = scalar_lea.vmem %s2454_s30, %s1681_s28 [#allocation3]   ;;  %s1044_s22 = scalar_lea.vmem %s2491_s24, %s1681_s28   ;;  %v1036_v46 = vld [vmem:[%s2131_s14 + $0x2c] sm:$0xf] }
 0x23b   : >> { %1027 = vst [vmem:[%s2127_s29 + $0x2c] sm:$0xf] %v1026_v41  ;;  %s2643_s14 = smov %s1043_s0  ;;  %s2644_s21 = smov %s2661_s27 }
 0x23c   : >> { %1029 = vst [vmem:[%s2127_s29 + $0x30] sm:$0xf] %v1028_v42  ;;  %1010 = sbr.rel (!%p1007_p10) target bundleno = 564 (0x234), region = 332 }
 0x23d   : >> { %1031 = vst [vmem:[%s2127_s29 + $0x48] sm:$0xf] %v1030_v43 }
 0x23e   : >> { %1033 = vst [vmem:[%s2127_s29 + $0x4c] sm:$0xf] %v1032_v44 }
 0x23f   : >> { %1035 = vst [vmem:[%s2127_s29 + $0x50] sm:$0xf] %v1034_v45 }
 0x240   : >> { %1037 = vst [vmem:[%s2127_s29 + $0x54] sm:$0xf] %v1036_v46  ;;  %s2642_s29 = smov %s1044_s22 }
 0x241 PF: > { %s2544_s18 = sand.u32 3, %s2659_s15   ;;  %s1725_s11 = sshll.u32 %s2497_s20, 4 }
 0x242   : > { %s2548_s26 = scalar_lea.vmem %s2454_s30, %s1725_s11 [#allocation3]   ;;  %s2551_s28 = scalar_lea.vmem %s2491_s24, %s1725_s11  }
 0x243   : > { %p1686_p11 = scmp.le.s32.totalorder %s2544_s18, 0 }
 0x244   : > { %s2645_s25 = smov (!%p1686_p11), %s2551_s28  ;;  %s2145_s27 = smov (!%p1686_p11), %s2548_s26  }
 0x245   : > { %1506 = sbr.rel (%p1686_p11) target bundleno = 594 (0x252), region = 337  ;;  %s2149_s29 = smov (!%p1686_p11), 0  }
 0x246   : > { %s2153_s14 = smov (!%p1686_p11), 0  }
 0x24a LB: >> { %v1061_v47 = vld [vmem:[%s2147_s27] sm:$0xf]  ;;  %v1063_v48 = vld [vmem:[%s2147_s27 + $0x10] sm:$0xf]  ;;  %s1067_s30 = sadd.s32 1, %s2151_s29  ;;  %s1055_s14 = sadd.s32 1, %s2155_s14   ;;  %s2155_s14 = sphi %s2153_s14, %s1055_s14   ;;  %s2151_s29 = sphi %s2149_s29, %s2150_s29   ;;  %s2147_s27 = sphi %s2145_s27, %s1072_s27   ;;  %s2143_s25 = sphi %s2645_s25, %s1073_s25  }
 0x24b   : >> { %v1065_v49 = vld [vmem:[%s2147_s27 + $0x20] sm:$0xf]  ;;  %1062 = vst [vmem:[%s2143_s25] sm:$0xf] %v1061_v47  ;;  %p1068_p12 = scmp.ge.s32.totalorder %s1067_s30, %s2544_s18  ;;  %p1054_p13 = scmp.ge.s32.totalorder %s1055_s14, %s2544_s18 }
 0x24c   : >> { %1064 = vst [vmem:[%s2143_s25 + $0x24] sm:$0xf] %v1063_v48 }
 0x24d   : >> { %1066 = vst [vmem:[%s2143_s25 + $0x48] sm:$0xf] %v1065_v49  ;;  %s2663_s30 = smov (%p1068_p12, %s1067_s30), 0  ;;  %1057 = sbr.rel (!%p1054_p13) target bundleno = 586 (0x24a), region = 343 }
 0x24e   : >> { %s1687_s15 = sshll.u32 %s2663_s30, 2  ;;  %s2150_s29 = smov %s2663_s30  }
 0x24f   : >> { %s1072_s27 = scalar_lea.vmem %s2548_s26, %s1687_s15 [#allocation3]   ;;  %s1073_s25 = scalar_lea.vmem %s2551_s28, %s1687_s15  }
 0x252 PF: > { %1191 = sbr.rel (!%p2271_p5) target bundleno = 639 (0x27f), region = 180  ;;  %s1193_s24 = ssub.s32 (%p2271_p5), 9, %s2382_s19 }
 0x253   : > { %s1727_s20 = sshll.u32 (%p2271_p5), %s2256_s12, 4  ;;  %p1194_p0 = scmp.lt.s32.totalorder (%p2271_p5), %s1193_s24, 4 }
 0x254   : > { %s2572_s22 = scalar_lea.vmem (%p2271_p5), %s2630_s9, %s1727_s20  }
 0x257   : > { %s2665_s24 = smov (!%p1194_p0, %s1193_s24), 4 }
 0x258   : > { %s1690_s11 = sshll.u32 %s2665_s24, 2 }
 0x259   : > { %p1693_p1 = scmp.eq.s32.totalorder %s1690_s11, 0 }
 0x25a   : > { %s2578_s18 = sshrl.u32 (!%p1693_p1), %s2665_s24, 2 }
 0x25b   : > { %1202 = sbr.rel (%p1693_p1) target bundleno = 639 (0x27f), region = 184  ;;  %p1694_p5 = scmp.le.s32.totalorder (!%p1693_p1), %s2578_s18, 0 }
 0x260   : > { %1520 = sbr.rel (%p1694_p5) target bundleno = 622 (0x26e), region = 348  ;;  %s2646_s12 = smov (!%p1694_p5), %s2572_s22 }
 0x261   : > { %s2647_s17 = smov (!%p1694_p5), %s2442_s23  ;;  %s2587_s19 = smov (!%p1694_p5), 0  }
 0x262   : > { %s2169_s26 = smov (!%p1694_p5), 0  }
 0x265 LB: >> { %v1219_v50 = vld [vmem:[%s2163_s17] sm:$0xf]  ;;  %v1221_v51 = vld [vmem:[%s2163_s17 + $0x4] sm:$0xf]  ;;  %v1223_v52 = vld [vmem:[%s2163_s17 + $0x8] sm:$0xf]  ;;  %s2171_s26 = sphi %s2169_s26, %s1213_s26   ;;  %s2167_s19 = sphi %s2587_s19, %s2648_s19   ;;  %s2163_s17 = sphi %s2647_s17, %s1232_s17   ;;  %s2159_s12 = sphi %s2646_s12, %s1233_s12  }
 0x266   : >> { %1220 = vst [vmem:[%s2159_s12] sm:$0xf] %v1219_v50  ;;  %v1225_v53 = vld [vmem:[%s2163_s17 + $0xc] sm:$0xf]  ;;  %s1227_s28 = sadd.s32 1, %s2167_s19  ;;  %s1213_s26 = sadd.s32 1, %s2171_s26  }
 0x267   : >> { %1222 = vst [vmem:[%s2159_s12 + $0x4] sm:$0xf] %v1221_v51  ;;  %p1228_p2 = scmp.ge.s32.totalorder %s1227_s28, %s2578_s18  ;;  %p1212_p3 = scmp.ge.s32.totalorder %s1213_s26, %s2578_s18 }
 0x268   : >> { %1224 = vst [vmem:[%s2159_s12 + $0x8] sm:$0xf] %v1223_v52 }
 0x269   : >> { %1226 = vst [vmem:[%s2159_s12 + $0xc] sm:$0xf] %v1225_v53  ;;  %s2667_s28 = smov (%p1228_p2, %s1227_s28), 0  ;;  %1215 = sbr.rel (!%p1212_p3) target bundleno = 613 (0x265), region = 354 }
 0x26a   : >> { %s1695_s25 = sshll.u32 %s2667_s28, 4  ;;  %s2648_s19 = smov %s2667_s28 }
 0x26b   : >> { %s1232_s17 = scalar_lea.vmem %s2442_s23, %s1695_s25 [#allocation4]   ;;  %s1233_s12 = scalar_lea.vmem %s2572_s22, %s1695_s25  }
 0x26e PF: > { %s2603_s27 = sand.u32 3, %s2665_s24   ;;  %s1728_s29 = sshll.u32 %s2578_s18, 4 }
 0x26f   : > { %s1238_s14 = scalar_lea.vmem %s2442_s23, %s1728_s29 [#allocation4]   ;;  %s1240_s30 = scalar_lea.vmem %s2572_s22, %s1728_s29  }
 0x270   : > { %p1700_p4 = scmp.le.s32.totalorder %s2603_s27, 0 }
 0x271   : > { %s2173_s15 = smov (!%p1700_p4), %s1240_s30   ;;  %s2177_s20 = smov (!%p1700_p4), %s1238_s14  }
 0x272   : > { %1534 = sbr.rel (%p1700_p4) target bundleno = 639 (0x27f), region = 359  ;;  %s2181_s21 = smov (!%p1700_p4), 0  }
 0x273   : > { %s2185_s0 = smov (!%p1700_p4), 0  }
 0x277 LB: >> { %v1250_v54 = vld [vmem:[%s2179_s20] sm:$0xf]  ;;  %s1252_s24 = sadd.s32 1, %s2183_s21  ;;  %s1244_s0 = sadd.s32 1, %s2187_s0   ;;  %s2187_s0 = sphi %s2185_s0, %s1244_s0   ;;  %s2183_s21 = sphi %s2181_s21, %s2182_s21   ;;  %s2179_s20 = sphi %s2177_s20, %s1257_s20   ;;  %s2175_s15 = sphi %s2173_s15, %s1258_s15  }
 0x278   : >> { %1251 = vst [vmem:[%s2175_s15] sm:$0xf] %v1250_v54  ;;  %p1253_p6 = scmp.ge.s32.totalorder %s1252_s24, %s2603_s27  ;;  %p1243_p7 = scmp.ge.s32.totalorder %s1244_s0, %s2603_s27 }
 0x27a   : >> { %s2669_s24 = smov (%p1253_p6, %s1252_s24), 0  ;;  %1246 = sbr.rel (!%p1243_p7) target bundleno = 631 (0x277), region = 365 }
 0x27b   : >> { %s1701_s23 = sshll.u32 %s2669_s24, 2  ;;  %s2182_s21 = smov %s2669_s24  }
 0x27c   : >> { %s1257_s20 = scalar_lea.vmem %s1238_s14, %s1701_s23 [#allocation4]   ;;  %s1258_s15 = scalar_lea.vmem %s1240_s30, %s1701_s23  }
 0x27f PF: > { %p17_p8 = scmp.ge.s32.totalorder %s2259_s13, 5   ;;  %s2649_s30 = smov %s2087_s10 }
 0x280   : > { %s2650_s10 = smov %s2269_s16  ;;  %s2651_s11 = smov %s2259_s13 }
 0x281   :  { %19 = sbr.rel (!%p17_p8) target bundleno = 4 (0x4), region = 376 }

</bundles_post_ra>
